<compile_context>
chip_gen: v5e
topology: v5e:2x2
jax: 0.10.0
libtpu: 0.0.40
codegen_flags: <defaults>
</compile_context>

<pallas_src>
import jax
import jax.numpy as jnp
from jax.experimental import pallas as pl
from jax.experimental.pallas import tpu as pltpu

# ------------------------- problem sizes (small, synthetic) -------------------------
N = 16              # num_nodes
F_IN = 8            # original input feature dim
H_EXP = 16          # explainer-GNN hidden dim (per layer)
D_EXP = 2 * H_EXP   # explainer embedding dim (concat of 2 layers) == sum(emb_dims)
E_HID = 64          # elayers hidden (nn.Linear(input_dim, 64))
E_PAD = 128         # E_HID zero-padded to a full 128-lane vreg (exactly neutral)
H_MOD = 16          # prediction-model hidden dim
D_MOD = 16          # prediction-model embedding dim
C_OUT = 4           # number of classes
QCHUNK = 8          # pairwise query-row chunk size

# ---------------- packed weight slab: every tensor at an 8-aligned row --------------
R_EXP_W0 = 0      # (F_IN, H_EXP)
R_EXP_B0 = 8      # (1, H_EXP)
R_EXP_W1 = 16     # (H_EXP, H_EXP)
R_EXP_B1 = 32     # (1, H_EXP)
R_EW1A = 40       # (D_EXP, E_PAD)  h0-facing half @40, h1-facing half @56
R_EW1B = 72       # (D_EXP, E_PAD)  h0-facing half @72, h1-facing half @88
R_EB1 = 104       # (1, E_PAD)
R_EW2 = 112       # (1, E_PAD)      second elayer weight, stored as a row
R_EB2 = 120       # (1, 128)        scalar bias, lane-replicated
R_MW0 = 128       # (F_IN, H_MOD)
R_MB0 = 136       # (1, H_MOD)
R_MW1 = 144       # (H_MOD, D_MOD)
R_MB1 = 160       # (1, D_MOD)
R_MWP = 168       # (D_MOD, C_OUT)
R_MBP = 184       # (1, C_OUT)
W_ROWS = 192

# ---------------- packed data slab and output slab layouts --------------------------
D_ROWS = 2 * N    # rows 0..15 : x (lanes 0..F_IN); rows 16..31 : adj (lanes 0..N)
O_ROWS = 32       # rows 0..15 : masked_adj; rows 16..17 : [res; inv_res];
                  # rows 24..25 : [g_embed; inv_embed]; rest zero padding


# ------------------------------- fused forward kernel -------------------------------
def fused_explain_kernel(data_ref, w_ref, out_ref, abig_scr):
    x = data_ref[0:N, 0:F_IN]                                             # (N, F_IN)
    adj = data_ref[N:2 * N, 0:N]                                          # (N, N)

    # ---- 1. explainer GCN embeddings (gnn_explainer.getEmbeddings) ----
    ax = jnp.dot(adj, x, preferred_element_type=jnp.float32)
    h0 = jnp.maximum(
        jnp.dot(ax, w_ref[R_EXP_W0:R_EXP_W0 + F_IN, 0:H_EXP],
                preferred_element_type=jnp.float32)
        + w_ref[R_EXP_B0:R_EXP_B0 + 1, 0:H_EXP], 0.0)                     # (N, H_EXP)
    ah0 = jnp.dot(adj, h0, preferred_element_type=jnp.float32)
    h1 = jnp.maximum(
        jnp.dot(ah0, w_ref[R_EXP_W1:R_EXP_W1 + H_EXP, 0:H_EXP],
                preferred_element_type=jnp.float32)
        + w_ref[R_EXP_B1:R_EXP_B1 + 1, 0:H_EXP], 0.0)                     # (N, H_EXP)

    # ---- 2. pairwise edge MLP + concrete_sample(training=False) -------
    # concat([f1, f2]) @ W1 + b1 == f1 @ W1a + f2 @ W1b + b1, and the emb concat
    # itself is avoided by consuming W1a/W1b as their h0-/h1-facing halves.
    p = (jnp.dot(h0, w_ref[R_EW1A:R_EW1A + H_EXP, :],
                 preferred_element_type=jnp.float32)
         + jnp.dot(h1, w_ref[R_EW1A + H_EXP:R_EW1A + D_EXP, :],
                   preferred_element_type=jnp.float32)
         + w_ref[R_EB1:R_EB1 + 1, :])                                     # (N, E_PAD)
    q = (jnp.dot(h0, w_ref[R_EW1B:R_EW1B + H_EXP, :],
                 preferred_element_type=jnp.float32)
         + jnp.dot(h1, w_ref[R_EW1B + H_EXP:R_EW1B + D_EXP, :],
                   preferred_element_type=jnp.float32))                   # (N, E_PAD)

    w2_row = w_ref[R_EW2:R_EW2 + 1, :]                                    # (1, E_PAD)
    b2_row = w_ref[R_EB2:R_EB2 + 1, 0:N]                                  # (1, N)

    # chunk query rows so the (QCHUNK, N, E_PAD) live set stays well inside the
    # 64-vreg register file (no VMEM spills); padded lanes contribute exactly 0.
    chunks = []
    for c in range(N // QCHUNK):
        pc = p[c * QCHUNK:(c + 1) * QCHUNK]                               # (QCHUNK, E_PAD)
        hc = jnp.maximum(pc[:, None, :] + q[None, :, :], 0.0)             # (QCHUNK, N, E_PAD)
        chunks.append(jnp.sum(hc * w2_row[None, :, :], axis=-1))          # (QCHUNK, N)
    vals = jnp.concatenate(chunks, axis=0) + b2_row                       # (N, N)

    mask = jax.nn.sigmoid(vals)                       # concrete_sample, training=False
    sym = (mask + mask.T) * 0.5
    masked = adj * sym                                                    # masked_adj
    inv_masked = adj * (1.0 - sym)                                        # inverse_masked_adj

    # ---- 3. both prediction passes fused via a 2N x 2N block-diagonal adjacency ----
    abig_scr[...] = jnp.zeros_like(abig_scr)
    abig_scr[0:N, 0:N] = masked
    abig_scr[N:2 * N, N:2 * N] = inv_masked
    a_big = abig_scr[...]                                                 # (2N, 2N)
    x_big = jnp.concatenate([x, x], axis=0)                               # (2N, F_IN)

    mw0 = w_ref[R_MW0:R_MW0 + F_IN, 0:H_MOD]
    mb0 = w_ref[R_MB0:R_MB0 + 1, 0:H_MOD]
    mw1 = w_ref[R_MW1:R_MW1 + H_MOD, 0:D_MOD]
    mb1 = w_ref[R_MB1:R_MB1 + 1, 0:D_MOD]
    mwp = w_ref[R_MWP:R_MWP + D_MOD, 0:C_OUT]
    mbp = w_ref[R_MBP:R_MBP + 1, 0:C_OUT]

    g0 = jnp.maximum(
        jnp.dot(jnp.dot(a_big, x_big, preferred_element_type=jnp.float32),
                mw0, preferred_element_type=jnp.float32) + mb0, 0.0)      # (2N, H_MOD)
    g1 = jnp.maximum(
        jnp.dot(jnp.dot(a_big, g0, preferred_element_type=jnp.float32),
                mw1, preferred_element_type=jnp.float32) + mb1, 0.0)      # (2N, D_MOD)
    pooled = jnp.concatenate(
        [jnp.max(g1[0:N], axis=0, keepdims=True),          # g_embed  (masked graph)
         jnp.max(g1[N:2 * N], axis=0, keepdims=True)],     # inv_embed (inverse graph)
        axis=0)                                                           # (2, D_MOD)
    logits = jnp.dot(pooled, mwp, preferred_element_type=jnp.float32) + mbp
    mx = jnp.max(logits, axis=-1, keepdims=True)
    ex = jnp.exp(logits - mx)
    probs = ex / jnp.sum(ex, axis=-1, keepdims=True)                      # (2, C_OUT)

    # ---- 4. single packed output slab: one writeback DMA, aligned sub-stores ----
    out_ref[...] = jnp.zeros_like(out_ref)
    out_ref[0:N, 0:N] = masked
    out_ref[16:18, 0:C_OUT] = probs           # row 16 = res, row 17 = inv_res
    out_ref[24:26, 0:D_MOD] = pooled          # row 24 = g_embed, row 25 = inv_embed


def explain_forward(x, adj, wslab):
    vmem = pl.BlockSpec(memory_space=pltpu.MemorySpace.VMEM)

    # pack x and adj into one lane-padded data slab (one input DMA instead of two)
    data = jnp.zeros((D_ROWS, 128), jnp.float32)
    data = data.at[0:N, 0:F_IN].set(x)
    data = data.at[N:2 * N, 0:N].set(adj)

    out = pl.pallas_call(
        fused_explain_kernel,
        out_shape=jax.ShapeDtypeStruct((O_ROWS, 128), jnp.float32),
        in_specs=[vmem, vmem],
        out_specs=vmem,
        scratch_shapes=[pltpu.VMEM((2 * N, 2 * N), jnp.float32)],
        cost_estimate=pl.CostEstimate(
            flops=500_000, transcendentals=300, bytes_accessed=190_000),
    )(data, wslab)

    masked_adj = out[0:N, 0:N]
    res = out[16:17, 0:C_OUT]
    inv_res = out[17:18, 0:C_OUT]
    g_embed = out[24:25, 0:D_MOD]
    inv_embed = out[25:26, 0:D_MOD]
    return res, masked_adj, g_embed, inv_embed, inv_res


explain_forward_jit = jax.jit(explain_forward)


# ------------------------------------ parameters ------------------------------------
def init_params(key):
    """Build the raw module weights and pack them into one (W_ROWS, 128) slab."""
    ks = jax.random.split(key, 11)
    s = 0.1

    def w(k, shape):
        return (s * jax.random.normal(k, shape)).astype(jnp.float32)

    raw = {
        # explainer GNN (gnn_explainer) weights
        "exp_w0": w(ks[0], (F_IN, H_EXP)),
        "exp_b0": jnp.zeros((1, H_EXP), jnp.float32),
        "exp_w1": w(ks[1], (H_EXP, H_EXP)),
        "exp_b1": jnp.zeros((1, H_EXP), jnp.float32),
        # elayers: Linear(2*D_EXP, 64) split into the f1/f2 halves, then Linear(64, 1)
        "e_w1a": w(ks[2], (D_EXP, E_HID)),
        "e_w1b": w(ks[3], (D_EXP, E_HID)),
        "e_b1": w(ks[4], (1, E_HID)),
        "e_w2": w(ks[5], (1, E_HID)),   # (64,1) weight stored transposed as a row
        "e_b2": w(ks[6], (1, 1)),
        # prediction model (self.model)
        "m_w0": w(ks[7], (F_IN, H_MOD)),
        "m_b0": jnp.zeros((1, H_MOD), jnp.float32),
        "m_w1": w(ks[8], (H_MOD, D_MOD)),
        "m_b1": jnp.zeros((1, D_MOD), jnp.float32),
        "m_wp": w(ks[9], (D_MOD, C_OUT)),
        "m_bp": w(ks[10], (1, C_OUT)),
    }

    slab = jnp.zeros((W_ROWS, 128), jnp.float32)

    def put(sl, row, arr):
        r, c = arr.shape
        return sl.at[row:row + r, 0:c].set(arr)

    slab = put(slab, R_EXP_W0, raw["exp_w0"])
    slab = put(slab, R_EXP_B0, raw["exp_b0"])
    slab = put(slab, R_EXP_W1, raw["exp_w1"])
    slab = put(slab, R_EXP_B1, raw["exp_b1"])
    # zero lane-padding 64 -> 128 is exactly neutral (relu(0)=0, padded w2 lanes = 0)
    slab = put(slab, R_EW1A, raw["e_w1a"])
    slab = put(slab, R_EW1B, raw["e_w1b"])
    slab = put(slab, R_EB1, raw["e_b1"])
    slab = put(slab, R_EW2, raw["e_w2"])
    slab = put(slab, R_EB2, jnp.broadcast_to(raw["e_b2"], (1, 128)))  # lane-replicated
    slab = put(slab, R_MW0, raw["m_w0"])
    slab = put(slab, R_MB0, raw["m_b0"])
    slab = put(slab, R_MW1, raw["m_w1"])
    slab = put(slab, R_MB1, raw["m_b1"])
    slab = put(slab, R_MWP, raw["m_wp"])
    slab = put(slab, R_MBP, raw["m_bp"])
    return slab


if __name__ == "__main__":
    key = jax.random.PRNGKey(0)
    k_x, k_a, k_p = jax.random.split(key, 3)

    # inputs: node features x [N, F_IN], symmetric binary adjacency adj [N, N]
    x = jax.random.normal(k_x, (N, F_IN), jnp.float32)
    a = (jax.random.uniform(k_a, (N, N)) > 0.6).astype(jnp.float32)
    adj = jnp.clip(a + a.T, 0.0, 1.0) * (1.0 - jnp.eye(N, dtype=jnp.float32))

    wslab = init_params(k_p)

    outs = explain_forward_jit(x, adj, wslab)
    outs = jax.block_until_ready(outs)

    res, masked_adj, g_embed, inv_embed, inv_res = outs
    assert res.shape == (1, C_OUT)
    assert masked_adj.shape == (N, N)
    assert g_embed.shape == (1, D_MOD)
    assert inv_embed.shape == (1, D_MOD)
    assert inv_res.shape == (1, C_OUT)
    assert bool(jnp.all(jnp.isfinite(res))) and bool(jnp.all(jnp.isfinite(inv_res)))
    assert bool(jnp.all(jnp.isfinite(masked_adj)))
    print("KERNEL_OK")
</pallas_src>

<mosaic_0001>
module attributes {stable_mosaic.version = 11 : i64} {
  func.func @fused_explain_kernel(%arg0: memref<32x128xf32, #tpu.memory_space<vmem>>, %arg1: memref<192x128xf32, #tpu.memory_space<vmem>>, %arg2: memref<32x128xf32, #tpu.memory_space<vmem>>, %arg3: memref<32x32xf32, #tpu.memory_space<vmem>>) attributes {dimension_semantics = [], scalar_prefetch = 0 : i64, scratch_operands = 1 : i64, tpu.core_type = #tpu.core_type<tc>} {
    %c0 = arith.constant 0 : index
    %c0_0 = arith.constant 0 : index
    %0 = vector.load %arg0[%c0, %c0_0] : memref<32x128xf32, #tpu.memory_space<vmem>>, vector<16x8xf32>
    %c16 = arith.constant 16 : index
    %c0_1 = arith.constant 0 : index
    %1 = vector.load %arg0[%c16, %c0_1] : memref<32x128xf32, #tpu.memory_space<vmem>>, vector<16x16xf32>
    %cst = arith.constant dense<0.000000e+00> : vector<16x8xf32>
    %2 = tpu.matmul %1, %0, %cst {dimension_numbers = #tpu.dot_dimension_numbers<[1], [0], [0], [1], [0, 0, 1, 1], [], []>} : vector<16x16xf32>, vector<16x8xf32>, vector<16x8xf32> -> vector<16x8xf32>
    %c0_2 = arith.constant 0 : index
    %c0_3 = arith.constant 0 : index
    %3 = vector.load %arg1[%c0_2, %c0_3] : memref<192x128xf32, #tpu.memory_space<vmem>>, vector<8x16xf32>
    %cst_4 = arith.constant dense<0.000000e+00> : vector<16x16xf32>
    %4 = tpu.matmul %2, %3, %cst_4 {dimension_numbers = #tpu.dot_dimension_numbers<[1], [0], [0], [1], [0, 0, 1, 1], [], []>} : vector<16x8xf32>, vector<8x16xf32>, vector<16x16xf32> -> vector<16x16xf32>
    %c8 = arith.constant 8 : index
    %c0_5 = arith.constant 0 : index
    %5 = vector.load %arg1[%c8, %c0_5] : memref<192x128xf32, #tpu.memory_space<vmem>>, vector<1x16xf32>
    %6 = vector.broadcast %5 : vector<1x16xf32> to vector<16x16xf32>
    %7 = arith.addf %4, %6 : vector<16x16xf32>
    %cst_6 = arith.constant 0.000000e+00 : f32
    %8 = vector.broadcast %cst_6 : f32 to vector<16x16xf32>
    %9 = arith.maximumf %7, %8 : vector<16x16xf32>
    %cst_7 = arith.constant dense<0.000000e+00> : vector<16x16xf32>
    %10 = tpu.matmul %1, %9, %cst_7 {dimension_numbers = #tpu.dot_dimension_numbers<[1], [0], [0], [1], [0, 0, 1, 1], [], []>} : vector<16x16xf32>, vector<16x16xf32>, vector<16x16xf32> -> vector<16x16xf32>
    %c16_8 = arith.constant 16 : index
    %c0_9 = arith.constant 0 : index
    %11 = vector.load %arg1[%c16_8, %c0_9] : memref<192x128xf32, #tpu.memory_space<vmem>>, vector<16x16xf32>
    %cst_10 = arith.constant dense<0.000000e+00> : vector<16x16xf32>
    %12 = tpu.matmul %10, %11, %cst_10 {dimension_numbers = #tpu.dot_dimension_numbers<[1], [0], [0], [1], [0, 0, 1, 1], [], []>} : vector<16x16xf32>, vector<16x16xf32>, vector<16x16xf32> -> vector<16x16xf32>
    %c32 = arith.constant 32 : index
    %c0_11 = arith.constant 0 : index
    %13 = vector.load %arg1[%c32, %c0_11] : memref<192x128xf32, #tpu.memory_space<vmem>>, vector<1x16xf32>
    %14 = vector.broadcast %13 : vector<1x16xf32> to vector<16x16xf32>
    %15 = arith.addf %12, %14 : vector<16x16xf32>
    %cst_12 = arith.constant 0.000000e+00 : f32
    %16 = vector.broadcast %cst_12 : f32 to vector<16x16xf32>
    %17 = arith.maximumf %15, %16 : vector<16x16xf32>
    %c40 = arith.constant 40 : index
    %c0_13 = arith.constant 0 : index
    %18 = vector.load %arg1[%c40, %c0_13] : memref<192x128xf32, #tpu.memory_space<vmem>>, vector<16x128xf32>
    %cst_14 = arith.constant dense<0.000000e+00> : vector<16x128xf32>
    %19 = tpu.matmul %9, %18, %cst_14 {dimension_numbers = #tpu.dot_dimension_numbers<[1], [0], [0], [1], [0, 0, 1, 1], [], []>} : vector<16x16xf32>, vector<16x128xf32>, vector<16x128xf32> -> vector<16x128xf32>
    %c56 = arith.constant 56 : index
    %c0_15 = arith.constant 0 : index
    %20 = vector.load %arg1[%c56, %c0_15] : memref<192x128xf32, #tpu.memory_space<vmem>>, vector<16x128xf32>
    %cst_16 = arith.constant dense<0.000000e+00> : vector<16x128xf32>
    %21 = tpu.matmul %17, %20, %cst_16 {dimension_numbers = #tpu.dot_dimension_numbers<[1], [0], [0], [1], [0, 0, 1, 1], [], []>} : vector<16x16xf32>, vector<16x128xf32>, vector<16x128xf32> -> vector<16x128xf32>
    %22 = arith.addf %19, %21 : vector<16x128xf32>
    %c104 = arith.constant 104 : index
    %c0_17 = arith.constant 0 : index
    %23 = vector.load %arg1[%c104, %c0_17] : memref<192x128xf32, #tpu.memory_space<vmem>>, vector<1x128xf32>
    %24 = vector.broadcast %23 : vector<1x128xf32> to vector<16x128xf32>
    %25 = arith.addf %22, %24 : vector<16x128xf32>
    %c72 = arith.constant 72 : index
    %c0_18 = arith.constant 0 : index
    %26 = vector.load %arg1[%c72, %c0_18] : memref<192x128xf32, #tpu.memory_space<vmem>>, vector<16x128xf32>
    %cst_19 = arith.constant dense<0.000000e+00> : vector<16x128xf32>
    %27 = tpu.matmul %9, %26, %cst_19 {dimension_numbers = #tpu.dot_dimension_numbers<[1], [0], [0], [1], [0, 0, 1, 1], [], []>} : vector<16x16xf32>, vector<16x128xf32>, vector<16x128xf32> -> vector<16x128xf32>
    %c88 = arith.constant 88 : index
    %c0_20 = arith.constant 0 : index
    %28 = vector.load %arg1[%c88, %c0_20] : memref<192x128xf32, #tpu.memory_space<vmem>>, vector<16x128xf32>
    %cst_21 = arith.constant dense<0.000000e+00> : vector<16x128xf32>
    %29 = tpu.matmul %17, %28, %cst_21 {dimension_numbers = #tpu.dot_dimension_numbers<[1], [0], [0], [1], [0, 0, 1, 1], [], []>} : vector<16x16xf32>, vector<16x128xf32>, vector<16x128xf32> -> vector<16x128xf32>
    %30 = arith.addf %27, %29 : vector<16x128xf32>
    %c112 = arith.constant 112 : index
    %c0_22 = arith.constant 0 : index
    %31 = vector.load %arg1[%c112, %c0_22] : memref<192x128xf32, #tpu.memory_space<vmem>>, vector<1x128xf32>
    %c120 = arith.constant 120 : index
    %c0_23 = arith.constant 0 : index
    %32 = vector.load %arg1[%c120, %c0_23] : memref<192x128xf32, #tpu.memory_space<vmem>>, vector<1x16xf32>
    %33 = vector.extract_strided_slice %25 {offsets = [0, 0], sizes = [8, 128], strides = [1, 1]} : vector<16x128xf32> to vector<8x128xf32>
    %34 = vector.shape_cast %33 : vector<8x128xf32> to vector<8x1x128xf32>
    %35 = vector.shape_cast %30 : vector<16x128xf32> to vector<1x16x128xf32>
    %36 = vector.broadcast %34 : vector<8x1x128xf32> to vector<8x16x128xf32>
    %37 = vector.broadcast %35 : vector<1x16x128xf32> to vector<8x16x128xf32>
    %38 = arith.addf %36, %37 : vector<8x16x128xf32>
    %cst_24 = arith.constant 0.000000e+00 : f32
    %39 = vector.broadcast %cst_24 : f32 to vector<8x16x128xf32>
    %40 = arith.maximumf %38, %39 : vector<8x16x128xf32>
    %41 = vector.shape_cast %31 : vector<1x128xf32> to vector<1x1x128xf32>
    %42 = vector.broadcast %41 : vector<1x1x128xf32> to vector<8x16x128xf32>
    %43 = arith.mulf %40, %42 : vector<8x16x128xf32>
    %cst_25 = arith.constant dense<0.000000e+00> : vector<8x16xf32>
    %44 = vector.multi_reduction <add>, %43, %cst_25 [2] : vector<8x16x128xf32> to vector<8x16xf32>
    %45 = vector.extract_strided_slice %25 {offsets = [8, 0], sizes = [8, 128], strides = [1, 1]} : vector<16x128xf32> to vector<8x128xf32>
    %46 = vector.shape_cast %45 : vector<8x128xf32> to vector<8x1x128xf32>
    %47 = vector.shape_cast %30 : vector<16x128xf32> to vector<1x16x128xf32>
    %48 = vector.broadcast %46 : vector<8x1x128xf32> to vector<8x16x128xf32>
    %49 = vector.broadcast %47 : vector<1x16x128xf32> to vector<8x16x128xf32>
    %50 = arith.addf %48, %49 : vector<8x16x128xf32>
    %cst_26 = arith.constant 0.000000e+00 : f32
    %51 = vector.broadcast %cst_26 : f32 to vector<8x16x128xf32>
    %52 = arith.maximumf %50, %51 : vector<8x16x128xf32>
    %53 = vector.shape_cast %31 : vector<1x128xf32> to vector<1x1x128xf32>
    %54 = vector.broadcast %53 : vector<1x1x128xf32> to vector<8x16x128xf32>
    %55 = arith.mulf %52, %54 : vector<8x16x128xf32>
    %cst_27 = arith.constant dense<0.000000e+00> : vector<8x16xf32>
    %56 = vector.multi_reduction <add>, %55, %cst_27 [2] : vector<8x16x128xf32> to vector<8x16xf32>
    %57 = tpu.concatenate %44, %56 in 0 : vector<8x16xf32>, vector<8x16xf32> -> vector<16x16xf32>
    %58 = vector.broadcast %32 : vector<1x16xf32> to vector<16x16xf32>
    %59 = arith.addf %57, %58 : vector<16x16xf32>
    %60 = arith.negf %59 : vector<16x16xf32>
    %61 = math.exp %60 : vector<16x16xf32>
    %cst_28 = arith.constant 1.000000e+00 : f32
    %62 = vector.broadcast %cst_28 : f32 to vector<16x16xf32>
    %63 = arith.addf %62, %61 : vector<16x16xf32>
    %64 = arith.divf %62, %63 : vector<16x16xf32>
    %65 = tpu.transpose %64, [1, 0] : vector<16x16xf32> -> vector<16x16xf32>
    %66 = arith.addf %64, %65 : vector<16x16xf32>
    %cst_29 = arith.constant 5.000000e-01 : f32
    %67 = vector.broadcast %cst_29 : f32 to vector<16x16xf32>
    %68 = arith.mulf %66, %67 : vector<16x16xf32>
    %69 = arith.mulf %1, %68 : vector<16x16xf32>
    %cst_30 = arith.constant 1.000000e+00 : f32
    %70 = vector.broadcast %cst_30 : f32 to vector<16x16xf32>
    %71 = arith.subf %70, %68 : vector<16x16xf32>
    %72 = arith.mulf %1, %71 : vector<16x16xf32>
    %cst_31 = arith.constant 0.000000e+00 : f32
    %73 = vector.broadcast %cst_31 : f32 to vector<32x32xf32>
    %c0_32 = arith.constant 0 : index
    %c0_33 = arith.constant 0 : index
    %74 = vector.load %arg3[%c0_32, %c0_33] : memref<32x32xf32, #tpu.memory_space<vmem>>, vector<32x32xf32>
    tpu.vector_store %arg3[%c0_32, %c0_33], %73 {strides = array<i32>} : memref<32x32xf32, #tpu.memory_space<vmem>>, vector<32x32xf32>,
    %c0_34 = arith.constant 0 : index
    %c0_35 = arith.constant 0 : index
    %75 = vector.load %arg3[%c0_34, %c0_35] : memref<32x32xf32, #tpu.memory_space<vmem>>, vector<16x16xf32>
    tpu.vector_store %arg3[%c0_34, %c0_35], %69 {strides = array<i32>} : memref<32x32xf32, #tpu.memory_space<vmem>>, vector<16x16xf32>,
    %c16_36 = arith.constant 16 : index
    %c16_37 = arith.constant 16 : index
    %76 = vector.load %arg3[%c16_36, %c16_37] : memref<32x32xf32, #tpu.memory_space<vmem>>, vector<16x16xf32>
    tpu.vector_store %arg3[%c16_36, %c16_37], %72 {strides = array<i32>} : memref<32x32xf32, #tpu.memory_space<vmem>>, vector<16x16xf32>,
    %c0_38 = arith.constant 0 : index
    %c0_39 = arith.constant 0 : index
    %77 = vector.load %arg3[%c0_38, %c0_39] : memref<32x32xf32, #tpu.memory_space<vmem>>, vector<32x32xf32>
    %78 = tpu.concatenate %0, %0 in 0 : vector<16x8xf32>, vector<16x8xf32> -> vector<32x8xf32>
    %c128 = arith.constant 128 : index
    %c0_40 = arith.constant 0 : index
    %79 = vector.load %arg1[%c128, %c0_40] : memref<192x128xf32, #tpu.memory_space<vmem>>, vector<8x16xf32>
    %c136 = arith.constant 136 : index
    %c0_41 = arith.constant 0 : index
    %80 = vector.load %arg1[%c136, %c0_41] : memref<192x128xf32, #tpu.memory_space<vmem>>, vector<1x16xf32>
    %c144 = arith.constant 144 : index
    %c0_42 = arith.constant 0 : index
    %81 = vector.load %arg1[%c144, %c0_42] : memref<192x128xf32, #tpu.memory_space<vmem>>, vector<16x16xf32>
    %c160 = arith.constant 160 : index
    %c0_43 = arith.constant 0 : index
    %82 = vector.load %arg1[%c160, %c0_43] : memref<192x128xf32, #tpu.memory_space<vmem>>, vector<1x16xf32>
    %c168 = arith.constant 168 : index
    %c0_44 = arith.constant 0 : index
    %83 = vector.load %arg1[%c168, %c0_44] : memref<192x128xf32, #tpu.memory_space<vmem>>, vector<16x4xf32>
    %c184 = arith.constant 184 : index
    %c0_45 = arith.constant 0 : index
    %84 = vector.load %arg1[%c184, %c0_45] : memref<192x128xf32, #tpu.memory_space<vmem>>, vector<1x4xf32>
    %cst_46 = arith.constant dense<0.000000e+00> : vector<32x8xf32>
    %85 = tpu.matmul %77, %78, %cst_46 {dimension_numbers = #tpu.dot_dimension_numbers<[1], [0], [0], [1], [0, 0, 1, 1], [], []>} : vector<32x32xf32>, vector<32x8xf32>, vector<32x8xf32> -> vector<32x8xf32>
    %cst_47 = arith.constant dense<0.000000e+00> : vector<32x16xf32>
    %86 = tpu.matmul %85, %79, %cst_47 {dimension_numbers = #tpu.dot_dimension_numbers<[1], [0], [0], [1], [0, 0, 1, 1], [], []>} : vector<32x8xf32>, vector<8x16xf32>, vector<32x16xf32> -> vector<32x16xf32>
    %87 = vector.broadcast %80 : vector<1x16xf32> to vector<32x16xf32>
    %88 = arith.addf %86, %87 : vector<32x16xf32>
    %cst_48 = arith.constant 0.000000e+00 : f32
    %89 = vector.broadcast %cst_48 : f32 to vector<32x16xf32>
    %90 = arith.maximumf %88, %89 : vector<32x16xf32>
    %cst_49 = arith.constant dense<0.000000e+00> : vector<32x16xf32>
    %91 = tpu.matmul %77, %90, %cst_49 {dimension_numbers = #tpu.dot_dimension_numbers<[1], [0], [0], [1], [0, 0, 1, 1], [], []>} : vector<32x32xf32>, vector<32x16xf32>, vector<32x16xf32> -> vector<32x16xf32>
    %cst_50 = arith.constant dense<0.000000e+00> : vector<32x16xf32>
    %92 = tpu.matmul %91, %81, %cst_50 {dimension_numbers = #tpu.dot_dimension_numbers<[1], [0], [0], [1], [0, 0, 1, 1], [], []>} : vector<32x16xf32>, vector<16x16xf32>, vector<32x16xf32> -> vector<32x16xf32>
    %93 = vector.broadcast %82 : vector<1x16xf32> to vector<32x16xf32>
    %94 = arith.addf %92, %93 : vector<32x16xf32>
    %cst_51 = arith.constant 0.000000e+00 : f32
    %95 = vector.broadcast %cst_51 : f32 to vector<32x16xf32>
    %96 = arith.maximumf %94, %95 : vector<32x16xf32>
    %97 = vector.extract_strided_slice %96 {offsets = [0, 0], sizes = [16, 16], strides = [1, 1]} : vector<32x16xf32> to vector<16x16xf32>
    %cst_52 = arith.constant dense<0xFF800000> : vector<16xf32>
    %98 = vector.multi_reduction <maximumf>, %97, %cst_52 [0] : vector<16x16xf32> to vector<16xf32>
    %99 = vector.shape_cast %98 : vector<16xf32> to vector<1x16xf32>
    %100 = vector.extract_strided_slice %96 {offsets = [16, 0], sizes = [16, 16], strides = [1, 1]} : vector<32x16xf32> to vector<16x16xf32>
    %cst_53 = arith.constant dense<0xFF800000> : vector<16xf32>
    %101 = vector.multi_reduction <maximumf>, %100, %cst_53 [0] : vector<16x16xf32> to vector<16xf32>
    %102 = vector.shape_cast %101 : vector<16xf32> to vector<1x16xf32>
    %103 = tpu.concatenate %99, %102 in 0 : vector<1x16xf32>, vector<1x16xf32> -> vector<2x16xf32>
    %cst_54 = arith.constant dense<0.000000e+00> : vector<2x4xf32>
    %104 = tpu.matmul %103, %83, %cst_54 {dimension_numbers = #tpu.dot_dimension_numbers<[1], [0], [0], [1], [0, 0, 1, 1], [], []>} : vector<2x16xf32>, vector<16x4xf32>, vector<2x4xf32> -> vector<2x4xf32>
    %105 = vector.broadcast %84 : vector<1x4xf32> to vector<2x4xf32>
    %106 = arith.addf %104, %105 : vector<2x4xf32>
    %cst_55 = arith.constant dense<0xFF800000> : vector<2xf32>
    %107 = vector.multi_reduction <maximumf>, %106, %cst_55 [1] : vector<2x4xf32> to vector<2xf32>
    %108 = vector.shape_cast %107 : vector<2xf32> to vector<2x1xf32>
    %109 = vector.broadcast %108 : vector<2x1xf32> to vector<2x4xf32>
    %110 = arith.subf %106, %109 : vector<2x4xf32>
    %111 = math.exp %110 : vector<2x4xf32>
    %cst_56 = arith.constant dense<0.000000e+00> : vector<2xf32>
    %112 = vector.multi_reduction <add>, %111, %cst_56 [1] : vector<2x4xf32> to vector<2xf32>
    %113 = vector.shape_cast %112 : vector<2xf32> to vector<2x1xf32>
    %114 = vector.broadcast %113 : vector<2x1xf32> to vector<2x4xf32>
    %115 = arith.divf %111, %114 : vector<2x4xf32>
    %cst_57 = arith.constant 0.000000e+00 : f32
    %116 = vector.broadcast %cst_57 : f32 to vector<32x128xf32>
    %c0_58 = arith.constant 0 : index
    %c0_59 = arith.constant 0 : index
    %117 = vector.load %arg2[%c0_58, %c0_59] : memref<32x128xf32, #tpu.memory_space<vmem>>, vector<32x128xf32>
    tpu.vector_store %arg2[%c0_58, %c0_59], %116 {strides = array<i32>} : memref<32x128xf32, #tpu.memory_space<vmem>>, vector<32x128xf32>,
    %c0_60 = arith.constant 0 : index
    %c0_61 = arith.constant 0 : index
    %118 = vector.load %arg2[%c0_60, %c0_61] : memref<32x128xf32, #tpu.memory_space<vmem>>, vector<16x16xf32>
    tpu.vector_store %arg2[%c0_60, %c0_61], %69 {strides = array<i32>} : memref<32x128xf32, #tpu.memory_space<vmem>>, vector<16x16xf32>,
    %c16_62 = arith.constant 16 : index
    %c0_63 = arith.constant 0 : index
    %119 = vector.load %arg2[%c16_62, %c0_63] : memref<32x128xf32, #tpu.memory_space<vmem>>, vector<2x4xf32>
    tpu.vector_store %arg2[%c16_62, %c0_63], %115 {strides = array<i32>} : memref<32x128xf32, #tpu.memory_space<vmem>>, vector<2x4xf32>,
    %c24 = arith.constant 24 : index
    %c0_64 = arith.constant 0 : index
    %120 = vector.load %arg2[%c24, %c0_64] : memref<32x128xf32, #tpu.memory_space<vmem>>, vector<2x16xf32>
    tpu.vector_store %arg2[%c24, %c0_64], %103 {strides = array<i32>} : memref<32x128xf32, #tpu.memory_space<vmem>>, vector<2x16xf32>,
    return
  }
}

</mosaic_0001>

<bundles_post_ra>
// kernel: explain_forward.1
= control target key start
LH: loop header
LB: loop body
LE: loop exit
PB: predicated region body
PF: predicated region fallthrough
CT: control target
= control target key end

     0   :  { %7 = vsyncpa [#allocation4], 0  ;;  %s1032_s12 = smov [#allocation3]   ;;  %s1033_s14 = smov 128   ;;  %s1374_s0 = inlined_call_operand.vmem [shape: f32[32,128], index: 0, kind: input, shape index: {}]   ;;  %s1375_s1 = inlined_call_operand.hbm [shape: f32[192,128], index: 1, kind: input, shape index: {}]   ;;  %s1376_s2 = inlined_call_operand.vmem [shape: f32[32,128], index: 2, kind: output, shape index: {}]  }
   0x1   :  { %s14_s11 = sshll.u32 %s1375_s1, 4  ;;  %s16_s13 = sshll.u32 %s1032_s12, 4  ;;  %s15_s11 = int_to_ptr.hbm [resolvable:$true] %s14_s11  ;;  %s17_s13 = int_to_ptr.vmem [resolvable:$true] %s16_s13 }
   0x2   :  { %s1034_s15 = smov 8  }
   0x3   :  { %22 = dma.hbm_to_vmem [thread:$0]  %s15_s11, 3072, %s17_s13, [#allocation4], %s1033_s14, %s1033_s14, %s1034_s15  }
   0x4   :  { %1030 = dma.done.wait [#allocation4], 3072  }
   0x5   :  { %1031 = vsyncadd [#allocation4], 4294964224  ;;  %v28_v0 = vld [vmem:[%s1374_s0 + $0x8] sm:$0xff]  ;;  %v27_v1 = vld [vmem:[%s1374_s0] sm:$0xff]  ;;  %vm31_vm0 = vcmask 130048   ;;  %vm64_vm1 = vcmask 64512  }
   0x6   :  { %52 = vmatpush.msra.mxu0 %v28_v0  ;;  %v1064_v2 = vld [vmem:[%s1374_s0 + $0x10] sm:$0xff]  ;;  %v1071_v3 = vld [vmem:[%s1374_s0 + $0x18] sm:$0xff]  ;;  %v61_v4 = vld [vmem:[#allocation3] sm:$0xff]  ;;  %vm502_vm2 = vcmask 130112   ;;  %vm525_vm3 = vcmask 1041409   ;;  %vm527_vm4 = vcmask 1042434  }
   0x7   :  { %86 = vmatpush.msra.mxu1 %v61_v4  ;;  %v155_v7 = vld [vmem:[#allocation3 + $0x30] sm:$0xff]  ;;  %v154_v8 = vld [vmem:[#allocation3 + $0x28] sm:$0xff]  ;;  %v120_v16 = vld [vmem:[#allocation3 + $0x18] sm:$0xff]  ;;  %vm529_vm5 = vcmask 1043459   ;;  %vm531_vm6 = vcmask 1044484   ;;  %vm533_vm7 = vcmask 1045509  }
   0x8   :  { %53 = vmatpush.msra.mxu0 %v27_v1  ;;  %v986_v9 = vld [vmem:[#allocation3 + $0x8] ss:$0 sm:$0xff]  ;;  %143 = vmatpush.msra.mxu3 %v120_v16  ;;  %v119_v17 = vld [vmem:[#allocation3 + $0x10] sm:$0xff]  ;;  %v157_v20 = vld [vmem:[#allocation3 + $0x40] sm:$0xff]  ;;  %vm535_vm8 = vcmask 1046534   ;;  %vm537_vm9 = vcmask 1047559  }
   0x9   :  { %946 = vmatmul.msk.f32.vlgmr.msra.gmra.mxu0 %vm31_vm0, %v1064_v2  ;;  %v221_v18 = vld [vmem:[#allocation3 + $0x50] sm:$0xff]  ;;  %v220_v19 = vld [vmem:[#allocation3 + $0x48] sm:$0xff]  ;;  %v223_v21 = vld [vmem:[#allocation3 + $0x60] sm:$0xff]  ;;  %178 = vmatpush.msrb.mxu1 %v157_v20  ;;  %vm671_vm10 = vcmask 261120   ;;  %s1036_s4 = smov 16  }
   0xa   :  { %207 = vmatpush.msrb.mxu0 %v155_v7  ;;  %144 = vmatpush.msra.mxu3 %v119_v17  ;;  %v156_v24 = vld [vmem:[#allocation3 + $0x38] sm:$0xff]  ;;  %v987_v26 = vld [vmem:[#allocation3 + $0x20] ss:$0 sm:$0xff]  ;;  %v988_v34 = vld [vmem:[#allocation3 + $0x68] ss:$0 sm:$0xff] }
   0xb   :  { %v222_v25 = vld [vmem:[#allocation3 + $0x58] sm:$0xff]  ;;  %179 = vmatpush.msrb.mxu1 %v156_v24  ;;  %v1106_v55 = vld [vmem:[#allocation3 + $0x70] ss:$0 sm:$0xff] }
   0xc   :  { %208 = vmatpush.msrb.mxu0 %v154_v8  ;;  %261 = vmatpush.msrb.mxu3 %v221_v18 }
   0xe   :  { %262 = vmatpush.msrb.mxu3 %v220_v19 }
  0x11   :  { %947 = vmatmul.msk.f32.gmra.mxu0 %vm31_vm0, %v1071_v3 }
  0x86   :  { %v55_v5 = vpop.f32.mrf.mxu0 }
  0x87   :  { %948 = vmatmul.msk.f32.vlgmr.msra.gmra.mxu1 %vm64_vm1, %v55_v5 }
  0x88   :  { %725 = vmatpush.msra.mxu1 %v28_v0 }
  0x8a   :  { %726 = vmatpush.msra.mxu1 %v27_v1 }
  0x8c   :  { %727 = vmatpush.msra.mxu1 %v28_v0 }
  0x8e   :  { %v58_v6 = vpop.f32.mrf.mxu0  ;;  %728 = vmatpush.msra.mxu1 %v27_v1 }
  0x8f   :  { %949 = vmatmul.msk.f32.gmra.mxu1 %vm64_vm1, %v58_v6 }
 0x104   :  { %v88_v10 = vpop.f32.mrf.mxu1 }
 0x105   :  { %v89_v11 = vadd.f32 %v986_v9, %v88_v10 }
 0x107   :  { %v94_v12 = vmax.f32 %v89_v11, 0.0 }
 0x109   :  { %956 = vmatmul.msk.f32.vlgmr.msrb.gmra.mxu0 %vm31_vm0, %v94_v12 }
 0x10c   :  { %v91_v13 = vpop.f32.mrf.mxu1 }
 0x10d   :  { %v92_v14 = vadd.f32 %v986_v9, %v91_v13 }
 0x10f   :  { %v95_v15 = vmax.f32 %v92_v14, 0.0 }
 0x111   :  { %110 = vmatpush.msra.mxu2 %v95_v15  ;;  %957 = vmatmul.msk.f32.gmra.mxu0 %vm31_vm0, %v95_v15 }
 0x113   :  { %111 = vmatpush.msra.mxu2 %v94_v12 }
 0x114   :  { %950 = vmatmul.msk.f32.vlgmr.msra.gmra.mxu2 %vm31_vm0, %v1064_v2 }
 0x115   :  { %238 = vmatpush.msrb.mxu2 %v223_v21 }
 0x117   :  { %239 = vmatpush.msrb.mxu2 %v222_v25 }
 0x11c   :  { %951 = vmatmul.msk.f32.gmra.mxu2 %vm31_vm0, %v1071_v3 }
 0x186   :  { %v210_v33 = vpop.f32.mrf.mxu0 }
 0x18e   :  { %v213_v49 = vpop.f32.mrf.mxu0 }
 0x197   :  { %v113_v22 = vpop.f32.mrf.mxu2 }
 0x198   :  { %952 = vmatmul.msk.f32.vlgmr.msra.gmra.mxu3 %vm31_vm0, %v113_v22 }
 0x19f   :  { %v116_v23 = vpop.f32.mrf.mxu2 }
 0x1a0   :  { %953 = vmatmul.msk.f32.gmra.mxu3 %vm31_vm0, %v116_v23 }
 0x1a8   :  { %960 = vmatmul.msk.f32.vlgmr.msrb.gmra.mxu3 %vm31_vm0, %v94_v12 }
 0x1b0   :  { %961 = vmatmul.msk.f32.gmra.mxu3 %vm31_vm0, %v95_v15 }
 0x21b   :  { %v146_v27 = vpop.f32.mrf.mxu3 }
 0x21c   :  { %v147_v28 = vadd.f32 %v987_v26, %v146_v27 }
 0x21e   :  { %v152_v29 = vmax.f32 %v147_v28, 0.0 }
 0x220   :  { %954 = vmatmul.msk.f32.vlgmr.msrb.gmra.mxu1 %vm31_vm0, %v152_v29  ;;  %958 = vmatmul.msk.f32.vlgmr.msrb.gmra.mxu2 %vm31_vm0, %v152_v29 }
 0x223   :  { %v149_v30 = vpop.f32.mrf.mxu3 }
 0x224   :  { %v150_v31 = vadd.f32 %v987_v26, %v149_v30 }
 0x226   :  { %v153_v32 = vmax.f32 %v150_v31, 0.0 }
 0x228   :  { %955 = vmatmul.msk.f32.gmra.mxu1 %vm31_vm0, %v153_v32  ;;  %959 = vmatmul.msk.f32.gmra.mxu2 %vm31_vm0, %v153_v32 }
 0x22b   :  { %v264_v41 = vpop.f32.mrf.mxu3 }
 0x233   :  { %v267_v23 = vpop.f32.mrf.mxu3 }
 0x29d   :  { %v181_v35 = vpop.f32.mrf.mxu1 }
 0x29e   :  { %v211_v36 = vadd.f32 %v210_v33, %v181_v35 }
 0x2a0   :  { %v1091_v37 = vadd.f32 %v988_v34, %v211_v36 }
 0x2a2   :  { %v274_v38 = vrot.slane %v1091_v37, 2  ;;  %v273_v39 = vrot.slane %v1091_v37, 1  ;;  %v276_v40 = vrot.slane %v1091_v37, 4  ;;  %v279_v43 = vrot.slane %v1091_v37, 7 }
 0x2a3   :  { %v241_v42 = vpop.f32.mrf.mxu2  ;;  %v275_v44 = vrot.slane %v1091_v37, 3  ;;  %v280_v48 = vperm.slane %v1091_v37, 0  ;;  %v277_v0 = vrot.slane %v1091_v37, 5  ;;  %v278_v1 = vrot.slane %v1091_v37, 6 }
 0x2a4   :  { %v1098_v45 = vadd.f32 %v264_v41, %v241_v42  ;;  %v282_v46 = vperm.slane %v274_v38, 0  ;;  %v281_v47 = vperm.slane %v273_v39, 0  ;;  %v1101_v51 = vperm.slane %v276_v40, 0 }
 0x2a5   :  { %v184_v50 = vpop.f32.mrf.mxu1  ;;  %v1103_v52 = vperm.slane %v279_v43, 0  ;;  %v1110_v58 = vperm.slane %v275_v44, 0  ;;  %v1125_v9 = vperm.slane %v277_v0, 0  ;;  %v1127_v12 = vperm.slane %v278_v1, 0 }
 0x2a6   :  { %v214_v53 = vadd.f32 %v213_v49, %v184_v50  ;;  %v300_v54 = vadd.f32 %v282_v46, %v1098_v45  ;;  %v298_v56 = vadd.f32 %v281_v47, %v1098_v45  ;;  %v296_v57 = vadd.f32 %v280_v48, %v1098_v45 }
 0x2a7   :  { %v304_v62 = vadd.f32 %v1101_v51, %v1098_v45  ;;  %v310_v63 = vadd.f32 %v1103_v52, %v1098_v45  ;;  %v302_v8 = vadd.f32 %v1110_v58, %v1098_v45  ;;  %v306_v15 = vadd.f32 %v1125_v9, %v1098_v45 }
 0x2a8   :  { %v316_v59 = vmax.f32 %v300_v54, 0.0  ;;  %v314_v60 = vmax.f32 %v298_v56, 0.0  ;;  %v312_v61 = vmax.f32 %v296_v57, 0.0  ;;  %v1118_v4 = vadd.f32 %v988_v34, %v214_v53 }
 0x2a9   :  { %v320_v10 = vmax.f32 %v304_v62, 0.0  ;;  %v326_v11 = vmax.f32 %v310_v63, 0.0  ;;  %v318_v14 = vmax.f32 %v302_v8, 0.0  ;;  %v308_v18 = vadd.f32 %v1127_v12, %v1098_v45 }
 0x2aa   :  { %v333_v5 = vmul.f32 %v1106_v55, %v316_v59  ;;  %v331_v6 = vmul.f32 %v1106_v55, %v314_v60  ;;  %v329_v7 = vmul.f32 %v1106_v55, %v312_v61  ;;  %v385_v13 = vperm.slane %v1118_v4, 0 }
 0x2ab   :  { %v337_v16 = vmul.f32 %v1106_v55, %v320_v10  ;;  %v343_v17 = vmul.f32 %v1106_v55, %v326_v11  ;;  %v244_v20 = vpop.f32.mrf.mxu2  ;;  %v335_v21 = vmul.f32 %v1106_v55, %v318_v14  ;;  %v382_v22 = vrot.slane %v1118_v4, 5 }
 0x2ac   :  { %353 = vadd.xlane.f32.xlu2 %v333_v5  ;;  %349 = vadd.xlane.f32.xlu1 %v331_v6  ;;  %v401_v19 = vadd.f32 %v385_v13, %v1098_v45  ;;  %v322_v24 = vmax.f32 %v306_v15, 0.0  ;;  %v1139_v25 = vadd.f32 %v267_v23, %v244_v20  ;;  %v324_v26 = vmax.f32 %v308_v18, 0.0 }
 0x2ad   :  { %345 = vadd.xlane.f32.xlu0 %v329_v7  ;;  %v1141_v28 = vperm.slane %v382_v22, 0  ;;  %v381_v29 = vrot.slane %v1118_v4, 4  ;;  %v383_v38 = vrot.slane %v1118_v4, 6  ;;  %v384_v39 = vrot.slane %v1118_v4, 7 }
 0x2ae   :  { %v417_v27 = vmax.f32 %v401_v19, 0.0  ;;  %v339_v30 = vmul.f32 %v1106_v55, %v322_v24  ;;  %v341_v31 = vmul.f32 %v1106_v55, %v324_v26  ;;  %v301_v33 = vadd.f32 %v282_v46, %v1139_v25 }
 0x2af   :  { %v299_v34 = vadd.f32 %v281_v47, %v1139_v25  ;;  %v297_v35 = vadd.f32 %v280_v48, %v1139_v25  ;;  %v411_v36 = vadd.f32 %v1141_v28, %v1098_v45  ;;  %v1152_v37 = vperm.slane %v381_v29, 0 }
 0x2b0   :  { %v433_v32 = vmul.f32 %v1106_v55, %v417_v27  ;;  %v1158_v42 = vperm.slane %v383_v38, 0  ;;  %v317_v43 = vmax.f32 %v301_v33, 0.0  ;;  %v1160_v46 = vperm.slane %v384_v39, 0 }
 0x2b1   :  { %v427_v40 = vmax.f32 %v411_v36, 0.0  ;;  %v409_v41 = vadd.f32 %v1152_v37, %v1098_v45  ;;  %v315_v44 = vmax.f32 %v299_v34, 0.0  ;;  %v313_v47 = vmax.f32 %v297_v35, 0.0 }
 0x2b2   :  { %v379_v50 = vrot.slane %v1118_v4, 2  ;;  %v413_v53 = vadd.f32 %v1158_v42, %v1098_v45  ;;  %v415_v54 = vadd.f32 %v1160_v46, %v1098_v45  ;;  %v402_v56 = vadd.f32 %v385_v13, %v1139_v25 }
 0x2b3   :  { %v1163_v48 = vmul.f32 %v1106_v55, %v427_v40  ;;  %v425_v49 = vmax.f32 %v409_v41, 0.0  ;;  %v303_v57 = vadd.f32 %v1110_v58, %v1139_v25  ;;  %v378_v59 = vrot.slane %v1118_v4, 1 }
 0x2b4   :  { %361 = vadd.xlane.f32.xlu2 %v337_v16  ;;  %373 = vadd.xlane.f32.xlu1 %v343_v17  ;;  %v334_v61 = vmul.f32 %v1106_v55, %v317_v43  ;;  %v332_v62 = vmul.f32 %v1106_v55, %v315_v44  ;;  %v429_v63 = vmax.f32 %v413_v53, 0.0  ;;  %v431_v0 = vmax.f32 %v415_v54, 0.0 }
 0x2b5   :  { %357 = vadd.xlane.f32.xlu0 %v335_v21  ;;  %v1175_v60 = vmul.f32 %v1106_v55, %v425_v49  ;;  %v330_v1 = vmul.f32 %v1106_v55, %v313_v47  ;;  %v305_v5 = vadd.f32 %v1101_v51, %v1139_v25  ;;  %v418_v7 = vmax.f32 %v402_v56, 0.0 }
 0x2b6   :  { %v1183_v58 = vmul.f32 %v1106_v55, %v429_v63  ;;  %v1186_v6 = vmul.f32 %v1106_v55, %v431_v0  ;;  %v319_v8 = vmax.f32 %v303_v57, 0.0  ;;  %v387_v10 = vperm.slane %v379_v50, 0 }
 0x2b7   :  { %v386_v11 = vperm.slane %v378_v59, 0  ;;  %v321_v13 = vmax.f32 %v305_v5, 0.0  ;;  %v380_v14 = vrot.slane %v1118_v4, 3  ;;  %v434_v15 = vmul.f32 %v1106_v55, %v418_v7 }
 0x2b8   :  { %v336_v51 = vmul.f32 %v1106_v55, %v319_v8  ;;  %v406_v16 = vadd.f32 %v387_v10, %v1139_v25  ;;  %v405_v27 = vadd.f32 %v387_v10, %v1098_v45  ;;  %v311_v36 = vadd.f32 %v1103_v52, %v1139_v25 }
 0x2b9   :  { %v404_v17 = vadd.f32 %v386_v11, %v1139_v25  ;;  %v338_v18 = vmul.f32 %v1106_v55, %v321_v13  ;;  %v403_v19 = vadd.f32 %v386_v11, %v1098_v45  ;;  %v388_v22 = vperm.slane %v380_v14, 0 }
 0x2ba   :  { %v422_v20 = vmax.f32 %v406_v16, 0.0  ;;  %v327_v39 = vmax.f32 %v311_v36, 0.0  ;;  %v410_v52 = vadd.f32 %v1152_v37, %v1139_v25  ;;  %v414_v50 = vadd.f32 %v1158_v42, %v1139_v25 }
 0x2bb   :  { %v420_v21 = vmax.f32 %v404_v17, 0.0  ;;  %v419_v23 = vmax.f32 %v403_v19, 0.0  ;;  %v407_v26 = vadd.f32 %v388_v22, %v1098_v45  ;;  %v309_v45 = vadd.f32 %v1127_v12, %v1139_v25 }
 0x2bc   :  { %365 = vadd.xlane.f32.xlu2 %v339_v30  ;;  %449 = vadd.xlane.f32.xlu1 %v433_v32  ;;  %v438_v4 = vmul.f32 %v1106_v55, %v422_v20  ;;  %v307_v30 = vadd.f32 %v1125_v9, %v1139_v25  ;;  %v421_v32 = vmax.f32 %v405_v27, 0.0  ;;  %v408_v9 = vadd.f32 %v388_v22, %v1139_v25 }
 0x2bd   :  { %369 = vadd.xlane.f32.xlu0 %v341_v31  ;;  %v436_v24 = vmul.f32 %v1106_v55, %v420_v21  ;;  %v435_v29 = vmul.f32 %v1106_v55, %v419_v23  ;;  %v423_v31 = vmax.f32 %v407_v26, 0.0  ;;  %v325_v40 = vmax.f32 %v309_v45, 0.0 }
 0x2be   :  { %v323_v33 = vmax.f32 %v307_v30, 0.0  ;;  %v437_v35 = vmul.f32 %v1106_v55, %v421_v32  ;;  %v424_v41 = vmax.f32 %v408_v9, 0.0  ;;  %v344_v43 = vmul.f32 %v1106_v55, %v327_v39 }
 0x2bf   :  { %v439_v34 = vmul.f32 %v1106_v55, %v423_v31  ;;  %v342_v44 = vmul.f32 %v1106_v55, %v325_v40  ;;  %v426_v12 = vmax.f32 %v410_v52, 0.0  ;;  %v412_v53 = vadd.f32 %v1141_v28, %v1139_v25 }
 0x2c0   :  { %v340_v38 = vmul.f32 %v1106_v55, %v323_v33  ;;  %v440_v47 = vmul.f32 %v1106_v55, %v424_v41  ;;  %v430_v37 = vmax.f32 %v414_v50, 0.0  ;;  %v416_v57 = vadd.f32 %v1160_v46, %v1139_v25  ;;  %v990_v50 = vld [vmem:[#allocation3 + $0x78] ss:$0 sm:$0xff] }
 0x2c1   :  { %v442_v49 = vmul.f32 %v1106_v55, %v426_v12  ;;  %v428_v54 = vmax.f32 %v412_v53, 0.0  ;;  %v497_v11 = vlaneseq }
 0x2c2   :  { %v446_v56 = vmul.f32 %v1106_v55, %v430_v37  ;;  %v432_v42 = vmax.f32 %v416_v57, 0.0 }
 0x2c3   :  { %v444_v59 = vmul.f32 %v1106_v55, %v428_v54  ;;  %v1233_v13 = vand.u32 127, %v497_v11 }
 0x2c4   :  { %355 = vadd.xlane.f32.xlu2 %v334_v61  ;;  %351 = vadd.xlane.f32.xlu1 %v332_v62  ;;  %v448_v28 = vmul.f32 %v1106_v55, %v432_v42 }
 0x2c5   :  { %347 = vadd.xlane.f32.xlu0 %v330_v1 }
 0x2cc   :  { %451 = vadd.xlane.f32.xlu2 %v434_v15  ;;  %359 = vadd.xlane.f32.xlu1 %v336_v51 }
 0x2cd   :  { %363 = vadd.xlane.f32.xlu0 %v338_v18 }
 0x2d4   :  { %459 = vadd.xlane.f32.xlu2 %v438_v4  ;;  %455 = vadd.xlane.f32.xlu1 %v436_v24 }
 0x2d5   :  { %453 = vadd.xlane.f32.xlu0 %v435_v29 }
 0x2dc   :  { %461 = vadd.xlane.f32.xlu2 %v439_v34  ;;  %457 = vadd.xlane.f32.xlu1 %v437_v35 }
 0x2dd   :  { %367 = vadd.xlane.f32.xlu0 %v340_v38 }
 0x2e4   :  { %375 = vadd.xlane.f32.xlu2 %v344_v43  ;;  %371 = vadd.xlane.f32.xlu1 %v342_v44 }
 0x2e5   :  { %463 = vadd.xlane.f32.xlu0 %v440_v47 }
 0x2ec   :  { %469 = vadd.xlane.f32.xlu2 %v1163_v48  ;;  %467 = vadd.xlane.f32.xlu1 %v442_v49 }
 0x2ed   :  { %465 = vadd.xlane.f32.xlu0 %v1175_v60 }
 0x2f4   :  { %475 = vadd.xlane.f32.xlu2 %v446_v56  ;;  %473 = vadd.xlane.f32.xlu1 %v1183_v58 }
 0x2f5   :  { %471 = vadd.xlane.f32.xlu0 %v444_v59 }
 0x2fc   :  { %479 = vadd.xlane.f32.xlu1 %v448_v28 }
 0x2fd   :  { %477 = vadd.xlane.f32.xlu0 %v1186_v6  ;;  %v1236_v6 = vadd.s32 4294967288, %v1233_v13 }
 0x31f   :  { %v354_v48 = vpop.xlane.xlu2 %353  ;;  %v350_v60 = vpop.xlane.xlu1 %349 }
 0x320   :  { %v346_v61 = vpop.xlane.xlu0 %345  ;;  %v504_v18 = vperm.slane %v350_v60, %v1233_v13  ;;  %v507_v26 = vperm.slane %v354_v48, %v1233_v13 }
 0x321   :  { %v499_v19 = vperm.slane %v346_v61, %v1233_v13 }
 0x327   :  { %v362_v62 = vpop.xlane.xlu2 %361  ;;  %v374_v63 = vpop.xlane.xlu1 %373 }
 0x328   :  { %v358_v0 = vpop.xlane.xlu0 %357  ;;  %v513_v35 = vperm.slane %v362_v62, %v1233_v13  ;;  %v522_v39 = vperm.slane %v374_v63, %v1233_v13 }
 0x329   :  { %v510_v29 = vperm.slane %v358_v0, %v1233_v13 }
 0x32f   :  { %v366_v1 = vpop.xlane.xlu2 %365  ;;  %v1229_v25 = vpop.xlane.xlu1 %449 }
 0x330   :  { %v370_v46 = vpop.xlane.xlu0 %369  ;;  %v516_v36 = vperm.slane %v366_v1, %v1233_v13 }
 0x331   :  { %v519_v44 = vperm.slane %v370_v46, %v1233_v13 }
 0x337   :  { %v356_v5 = vpop.xlane.xlu2 %355  ;;  %v352_v7 = vpop.xlane.xlu1 %351 }
 0x338   :  { %v348_v58 = vpop.xlane.xlu0 %347  ;;  %v505_v17 = vperm.slane %v352_v7, %v1236_v6  ;;  %v508_v20 = vperm.slane %v356_v5, %v1236_v6 }
 0x339   :  { %v501_v16 = vperm.slane %v348_v58, %v1236_v6 }
 0x33a   :  { %v506_v22 = vsel %vm502_vm2, %v505_v17, %v504_v18  ;;  %v509_v30 = vsel %vm502_vm2, %v508_v20, %v507_v26 }
 0x33b   :  { %v503_v21 = vsel %vm502_vm2, %v501_v16, %v499_v19 }
 0x33c   :  { %v526_v31 = vsel %vm525_vm3, %v506_v22, %v503_v21 }
 0x33d   :  { %v528_v45 = vsel %vm527_vm4, %v509_v30, %v526_v31 }
 0x33f   :  { %v1231_v8 = vpop.xlane.xlu2 %451  ;;  %v360_v10 = vpop.xlane.xlu1 %359 }
 0x340   :  { %v364_v55 = vpop.xlane.xlu0 %363  ;;  %v511_v23 = vperm.slane %v360_v10, %v1236_v6  ;;  %v557_v0 = vperm.slane %v1231_v8, %v1236_v6 }
 0x341   :  { %v514_v32 = vperm.slane %v364_v55, %v1236_v6  ;;  %v556_v55 = vperm.slane %v1229_v25, %v1233_v13 }
 0x342   :  { %v512_v33 = vsel %vm502_vm2, %v511_v23, %v510_v29 }
 0x343   :  { %v515_v38 = vsel %vm502_vm2, %v514_v32, %v513_v35  ;;  %v530_v9 = vsel %vm529_vm5, %v512_v33, %v528_v45  ;;  %v558_v18 = vsel %vm502_vm2, %v557_v0, %v556_v55 }
 0x344   :  { %v532_v49 = vsel %vm531_vm6, %v515_v38, %v530_v9 }
 0x347   :  { %v1238_v14 = vpop.xlane.xlu2 %459  ;;  %v1240_v15 = vpop.xlane.xlu1 %455 }
 0x348   :  { %v1242_v51 = vpop.xlane.xlu0 %453  ;;  %v560_v61 = vperm.slane %v1240_v15, %v1236_v6  ;;  %v563_v5 = vperm.slane %v1238_v14, %v1236_v6 }
 0x349   :  { %v559_v62 = vperm.slane %v1242_v51, %v1233_v13 }
 0x34b   :  { %v561_v11 = vsel %vm502_vm2, %v560_v61, %v559_v62 }
 0x34c   :  { %v580_v25 = vsel %vm525_vm3, %v561_v11, %v558_v18 }
 0x34f   :  { %v1252_v4 = vpop.xlane.xlu2 %461  ;;  %v458_v24 = vpop.xlane.xlu1 %457 }
 0x350   :  { %v368_v27 = vpop.xlane.xlu0 %367  ;;  %v562_v63 = vperm.slane %v458_v24, %v1233_v13  ;;  %v565_v15 = vperm.slane %v1252_v4, %v1233_v13 }
 0x351   :  { %v517_v34 = vperm.slane %v368_v27, %v1236_v6 }
 0x352   :  { %v564_v17 = vsel %vm502_vm2, %v563_v5, %v562_v63 }
 0x353   :  { %v518_v40 = vsel %vm502_vm2, %v517_v34, %v516_v36  ;;  %v581_v4 = vsel %vm527_vm4, %v564_v17, %v580_v25 }
 0x354   :  { %v534_v53 = vsel %vm533_vm7, %v518_v40, %v532_v49 }
 0x357   :  { %v376_v41 = vpop.xlane.xlu2 %375  ;;  %v372_v43 = vpop.xlane.xlu1 %371 }
 0x358   :  { %v523_v52 = vperm.slane %v376_v41, %v1236_v6  ;;  %v520_v47 = vperm.slane %v372_v43, %v1236_v6  ;;  %v464_v12 = vpop.xlane.xlu0 %463  ;;  %v1035_v41 = vmov 0.0  }
 0x359   :  { %v566_v1 = vperm.slane %v464_v12, %v1236_v6  ;;  %672 = vst.msk [vmem:[#allocation2] sm:$0xff] %vm671_vm10, %v1035_v41 }
 0x35a   :  { %v524_v37 = vsel %vm502_vm2, %v523_v52, %v522_v39  ;;  %v521_v54 = vsel %vm502_vm2, %v520_v47, %v519_v44  ;;  %932 = vst [vmem:[%s1376_s2] sm:$0xff] %v1035_v41 }
 0x35b   :  { %v536_v56 = vsel %vm535_vm8, %v521_v54, %v534_v53  ;;  %v567_v19 = vsel %vm502_vm2, %v566_v1, %v565_v15  ;;  %673 = vst.msk [vmem:[#allocation2 + $0x8] sm:$0xff] %vm671_vm10, %v1035_v41 }
 0x35c   :  { %v538_v57 = vsel %vm537_vm9, %v524_v37, %v536_v56  ;;  %v582_v26 = vsel %vm529_vm5, %v567_v19, %v581_v4  ;;  %674 = vst.msk [vmem:[#allocation2 + $0x10] sm:$0xff] %vm671_vm10, %v1035_v41  ;;  %vm686_vm5 = vcmask 261248   ;;  %v991_v4 = vld [vmem:[#allocation3 + $0x88] ss:$0 sm:$0xff] }
 0x35d   :  { %v589_v59 = vadd.f32 %v990_v50, %v538_v57  ;;  %675 = vst.msk [vmem:[#allocation2 + $0x18] sm:$0xff] %vm671_vm10, %v1035_v41 }
 0x35e   :  { %933 = vst [vmem:[%s1376_s2 + $0x8] sm:$0xff] %v1035_v41 }
 0x35f   :  { %v470_v42 = vpop.xlane.xlu2 %469  ;;  %v468_v28 = vpop.xlane.xlu1 %467  ;;  %v962_v48 = vmul.f32 -1.442695, %v589_v59  ;;  %934 = vst [vmem:[%s1376_s2 + $0x10] sm:$0xff] %v1035_v41 }
 0x360   :  { %v466_v60 = vpop.xlane.xlu0 %465  ;;  %v569_v7 = vperm.slane %v468_v28, %v1236_v6  ;;  %v571_v20 = vperm.slane %v470_v42, %v1233_v13  ;;  %935 = vst [vmem:[%s1376_s2 + $0x18] sm:$0xff] %v1035_v41 }
 0x361   :  { %994 = vpow2.f32 %v962_v48  ;;  %v568_v58 = vperm.slane %v466_v60, %v1233_v13 }
 0x363   :  { %v570_v21 = vsel %vm502_vm2, %v569_v7, %v568_v58 }
 0x364   :  { %v583_v27 = vsel %vm531_vm6, %v570_v21, %v582_v26  ;;  %vm939_vm6 = vcmask 123904  }
 0x367   :  { %v995_v46 = vpop.eup %994  ;;  %v474_v10 = vpop.xlane.xlu1 %473 }
 0x368   :  { %v476_v8 = vpop.xlane.xlu2 %475  ;;  %v472_v51 = vpop.xlane.xlu0 %471  ;;  %v597_v16 = vadd.f32 1.0, %v995_v46  ;;  %v574_v23 = vperm.slane %v474_v10, %v1233_v13 }
 0x369   :  { %v572_v14 = vperm.slane %v472_v51, %v1236_v6  ;;  %v575_v22 = vperm.slane %v476_v8, %v1236_v6  ;;  %v693_v51 = vld [vmem:[#allocation3 + $0x80] sm:$0xff] }
 0x36a   :  { %996 = vrcp.f32 %v597_v16  ;;  %v610_v40 = vand.u32 2147483648, %v597_v16  ;;  %vm604_vm12 = vweird.f32 %v597_v16  ;;  %770 = vmatpush.msra.mxu0 %v693_v51 }
 0x36b   :  { %v573_v24 = vsel %vm502_vm2, %v572_v14, %v571_v20  ;;  %v576_v29 = vsel %vm502_vm2, %v575_v22, %v574_v23 }
 0x36c   :  { %v584_v30 = vsel %vm533_vm7, %v573_v24, %v583_v27  ;;  %v611_v47 = vor.u32 1.1754944e-38, %v610_v40  ;;  %v699_v40 = vld [vmem:[#allocation3 + $0xb0] sm:$0xff]  ;;  %vm907_vm7 = vcmask 25600  }
 0x36d   :  { %v585_v45 = vsel %vm535_vm8, %v576_v29, %v584_v30  ;;  %901 = vmatpush.msrb.mxu1 %v699_v40 }
 0x36f   :  { %v480_v31 = vpop.xlane.xlu1 %479 }
 0x370   :  { %v997_v32 = vpop.eup %996  ;;  %v578_v33 = vperm.slane %v480_v31, %v1236_v6  ;;  %v478_v34 = vpop.xlane.xlu0 %477  ;;  %v608_v6 = vand.u32 2147483647, %v597_v16  ;;  %v696_v31 = vld [vmem:[#allocation3 + $0x98] sm:$0xff] }
 0x371   :  { %v577_v35 = vperm.slane %v478_v34, %v1233_v13  ;;  %v600_v36 = vmul.f32 %v997_v32, %v597_v16  ;;  %vm605_vm11 = vweird.f32 %v997_v32  ;;  %844 = vmatpush.msra.mxu3 %v696_v31 }
 0x372   :  { %vm606_vm13 = vmor %vm604_vm12, %vm605_vm11  ;;  %vm609_vm14 = vcmp.eq.f32.partialorder %v608_v6, 8.507059e+37 }
 0x373   :  { %v579_v38 = vsel %vm502_vm2, %v578_v33, %v577_v35  ;;  %v601_v9 = vsub.f32 1.0, %v600_v36  ;;  %v695_v36 = vld [vmem:[#allocation3 + $0x90] sm:$0xff] }
 0x374   :  { %v586_v39 = vsel %vm537_vm9, %v579_v38, %v585_v45  ;;  %845 = vmatpush.msra.mxu3 %v695_v36 }
 0x375   :  { %v590_v43 = vadd.f32 %v990_v50, %v586_v39  ;;  %v602_v44 = vmul.f32 %v997_v32, %v601_v9 }
 0x377   :  { %v963_v13 = vmul.f32 -1.442695, %v590_v43  ;;  %v603_v52 = vadd.f32 %v997_v32, %v602_v44  ;;  %v992_v43 = vld [vmem:[#allocation3 + $0xa0] ss:$0 sm:$0xff] }
 0x379   :  { %998 = vpow2.f32 %v963_v13  ;;  %v607_v12 = vsel %vm606_vm13, %v997_v32, %v603_v52  ;;  %v698_v52 = vld [vmem:[#allocation3 + $0xa8] sm:$0xff] }
 0x37a   :  { %v612_v49 = vsel %vm609_vm14, %v611_v47, %v607_v12  ;;  %902 = vmatpush.msrb.mxu1 %v698_v52 }
 0x37b   :  { %629 = vxpose.xlu2.b32.start [1/2] (short) (narrow) %v612_v49, 16 }
 0x37f   :  { %v999_v50 = vpop.eup %998 }
 0x380   :  { %v598_v53 = vadd.f32 1.0, %v999_v50 }
 0x382   :  { %1000 = vrcp.f32 %v598_v53  ;;  %v625_v57 = vand.u32 2147483648, %v598_v53  ;;  %v623_v42 = vand.u32 2147483647, %v598_v53  ;;  %vm619_vm2 = vweird.f32 %v598_v53 }
 0x384   :  { %v626_v48 = vor.u32 1.1754944e-38, %v625_v57  ;;  %vm624_vm4 = vcmp.eq.f32.partialorder %v623_v42, 8.507059e+37 }
 0x388   :  { %v1001_v37 = vpop.eup %1000 }
 0x389   :  { %v615_v54 = vmul.f32 %v1001_v37, %v598_v53  ;;  %vm620_vm15 = vweird.f32 %v1001_v37 }
 0x38a   :  { %vm621_vm3 = vmor %vm619_vm2, %vm620_vm15 }
 0x38b   :  { %v616_v56 = vsub.f32 1.0, %v615_v54 }
 0x38d   :  { %v617_v59 = vmul.f32 %v1001_v37, %v616_v56 }
 0x38f   :  { %v618_v28 = vadd.f32 %v1001_v37, %v617_v59 }
 0x391   :  { %v622_v60 = vsel %vm621_vm3, %v1001_v37, %v618_v28 }
 0x392   :  { %v627_v61 = vsel %vm624_vm4, %v626_v48, %v622_v60 }
 0x393   :  { %630 = vxpose.xlu2.b32.end [2/2] (short) (narrow) %v627_v61, 16 }
 0x424   :  { %v645_v62 = vpop.trf.xlu2 }
 0x425   :  { %v661_v63 = vadd.f32 %v645_v62, %v612_v49 }
 0x427   :  { %v663_v0 = vmul.f32 0.5, %v661_v63 }
 0x429   :  { %v665_v1 = vmul.f32 %v663_v0, %v1064_v2  ;;  %v667_v46 = vsub.f32 1.0, %v663_v0 }
 0x42b   :  { %676 = vst.msk [vmem:[#allocation2] sm:$0xff] %vm31_vm0, %v665_v1  ;;  %v669_v5 = vmul.f32 %v667_v46, %v1064_v2 }
 0x42c   :  { %936 = vst.msk [vmem:[%s1376_s2] sm:$0xff] %vm31_vm0, %v665_v1  ;;  %v646_v7 = vpop.trf.xlu2 }
 0x42d   :  { %v662_v58 = vadd.f32 %v646_v7, %v627_v61  ;;  %680 = vrot.lane.b32.xlu0 %v669_v5, %s1036_s4 }
 0x42f   :  { %v664_v10 = vmul.f32 0.5, %v662_v58 }
 0x431   :  { %v666_v55 = vmul.f32 %v664_v10, %v1071_v3  ;;  %v668_v11 = vsub.f32 1.0, %v664_v10 }
 0x432   :  { %v689_v15 = vld [vmem:[#allocation2] sm:$0xff] }
 0x433   :  { %677 = vst.msk [vmem:[#allocation2 + $0x8] sm:$0xff] %vm31_vm0, %v666_v55  ;;  %964 = vmatmul.msk.f32.vlgmr.msra.gmra.mxu1 %vm671_vm10, %v689_v15  ;;  %v670_v2 = vmul.f32 %v668_v11, %v1071_v3 }
 0x434   :  { %937 = vst.msk [vmem:[%s1376_s2 + $0x8] sm:$0xff] %vm31_vm0, %v666_v55 }
 0x435   :  { %682 = vrot.lane.b32.xlu1 %v670_v2, %s1036_s4  ;;  %v993_v2 = vld [vmem:[#allocation3 + $0xb8] ss:$0 sm:$0xff] }
 0x43a   :  { %v690_v8 = vld [vmem:[#allocation2 + $0x8] sm:$0xff] }
 0x43b   :  { %965 = vmatmul.msk.f32.gmra.mxu1 %vm671_vm10, %v690_v8 }
 0x49f   :  { %v681_v16 = vpop.permute.xlu0 %680 }
 0x4a0   :  { %687 = vst.msk [vmem:[#allocation2 + $0x10] sm:$0xff] %vm686_vm5, %v681_v16 }
 0x4a7   :  { %v683_v17 = vpop.permute.xlu1 %682  ;;  %v691_v14 = vld [vmem:[#allocation2 + $0x10] sm:$0xff] }
 0x4a8   :  { %688 = vst.msk [vmem:[#allocation2 + $0x18] sm:$0xff] %vm686_vm5, %v683_v17  ;;  %966 = vmatmul.msk.f32.gmra.mxu1 %vm671_vm10, %v691_v14 }
 0x4af   :  { %v692_v3 = vld [vmem:[#allocation2 + $0x18] sm:$0xff] }
 0x4b0   :  { %v730_v18 = vpop.f32.mrf.mxu1  ;;  %967 = vmatmul.msk.f32.gmra.mxu1 %vm671_vm10, %v692_v3 }
 0x4b1   :  { %968 = vmatmul.msk.f32.vlgmr.msra.gmra.mxu0 %vm64_vm1, %v730_v18 }
 0x4b8   :  { %v733_v19 = vpop.f32.mrf.mxu1 }
 0x4b9   :  { %969 = vmatmul.msk.f32.gmra.mxu0 %vm64_vm1, %v733_v19 }
 0x525   :  { %v736_v20 = vpop.f32.mrf.mxu1 }
 0x526   :  { %970 = vmatmul.msk.f32.gmra.mxu0 %vm64_vm1, %v736_v20 }
 0x52d   :  { %v739_v25 = vpop.f32.mrf.mxu1 }
 0x52e   :  { %971 = vmatmul.msk.f32.gmra.mxu0 %vm64_vm1, %v739_v25  ;;  %v772_v21 = vpop.f32.mrf.mxu0  ;;  %vm881_vm1 = vcmask 1040384  }
 0x52f   :  { %v773_v32 = vadd.f32 %v991_v4, %v772_v21 }
 0x531   :  { %v784_v35 = vmax.f32 %v773_v32, 0.0 }
 0x536   :  { %v775_v22 = vpop.f32.mrf.mxu0 }
 0x537   :  { %v776_v29 = vadd.f32 %v991_v4, %v775_v22 }
 0x539   :  { %v785_v34 = vmax.f32 %v776_v29, 0.0 }
 0x5a3   :  { %v778_v23 = vpop.f32.mrf.mxu0 }
 0x5a4   :  { %v779_v26 = vadd.f32 %v991_v4, %v778_v23 }
 0x5a6   :  { %v786_v33 = vmax.f32 %v779_v26, 0.0 }
 0x5ab   :  { %v781_v24 = vpop.f32.mrf.mxu0 }
 0x5ac   :  { %v782_v27 = vadd.f32 %v991_v4, %v781_v24 }
 0x5ae   :  { %v787_v30 = vmax.f32 %v782_v27, 0.0 }
 0x5b0   :  { %800 = vmatpush.msra.mxu2 %v787_v30 }
 0x5b2   :  { %801 = vmatpush.msra.mxu2 %v786_v33 }
 0x5b4   :  { %802 = vmatpush.msra.mxu2 %v785_v34 }
 0x5b6   :  { %803 = vmatpush.msra.mxu2 %v784_v35 }
 0x5b7   :  { %972 = vmatmul.msk.f32.vlgmr.msra.gmra.mxu2 %vm671_vm10, %v689_v15 }
 0x5bf   :  { %973 = vmatmul.msk.f32.gmra.mxu2 %vm671_vm10, %v690_v8 }
 0x5c7   :  { %974 = vmatmul.msk.f32.gmra.mxu2 %vm671_vm10, %v691_v14 }
 0x5cf   :  { %975 = vmatmul.msk.f32.gmra.mxu2 %vm671_vm10, %v692_v3 }
 0x63a   :  { %v805_v45 = vpop.f32.mrf.mxu2 }
 0x63b   :  { %976 = vmatmul.msk.f32.vlgmr.msra.gmra.mxu3 %vm31_vm0, %v805_v45 }
 0x642   :  { %v808_v38 = vpop.f32.mrf.mxu2 }
 0x643   :  { %977 = vmatmul.msk.f32.gmra.mxu3 %vm31_vm0, %v808_v38 }
 0x64a   :  { %v811_v9 = vpop.f32.mrf.mxu2 }
 0x64b   :  { %978 = vmatmul.msk.f32.gmra.mxu3 %vm31_vm0, %v811_v9 }
 0x652   :  { %v814_v39 = vpop.f32.mrf.mxu2 }
 0x653   :  { %979 = vmatmul.msk.f32.gmra.mxu3 %vm31_vm0, %v814_v39 }
 0x6be   :  { %v847_v41 = vpop.f32.mrf.mxu3 }
 0x6bf   :  { %v848_v6 = vadd.f32 %v992_v43, %v847_v41 }
 0x6c1   :  { %v859_v12 = vmax.f32 %v848_v6, 0.0 }
 0x6c3   :  { %v863_v53 = vsel %vm31_vm0, %v859_v12, -inf }
 0x6c6   :  { %v850_v44 = vpop.f32.mrf.mxu3 }
 0x6c7   :  { %v851_v13 = vadd.f32 %v992_v43, %v850_v44 }
 0x6c9   :  { %v860_v47 = vmax.f32 %v851_v13, 0.0 }
 0x6cb   :  { %v864_v49 = vsel %vm31_vm0, %v860_v47, -inf }
 0x6cc   :  { %v865_v37 = vmax.f32 %v863_v53, %v864_v49 }
 0x6ce   :  { %v853_v50 = vpop.f32.mrf.mxu3  ;;  %v866_v56 = vrot.slane %v865_v37, 4 }
 0x6cf   :  { %v854_v54 = vadd.f32 %v992_v43, %v853_v50 }
 0x6d0   :  { %v867_v28 = vmax.f32 %v865_v37, %v866_v56 }
 0x6d1   :  { %v861_v59 = vmax.f32 %v854_v54, 0.0 }
 0x6d2   :  { %v868_v62 = vrot.slane %v867_v28, 2 }
 0x6d3   :  { %v872_v60 = vsel %vm31_vm0, %v861_v59, -inf }
 0x6d4   :  { %v869_v1 = vmax.f32 %v867_v28, %v868_v62 }
 0x6d6   :  { %v856_v57 = vpop.f32.mrf.mxu3  ;;  %v870_v7 = vrot.slane %v869_v1, 1 }
 0x6d7   :  { %v857_v42 = vadd.f32 %v992_v43, %v856_v57 }
 0x6d8   :  { %v871_v55 = vmax.f32 %v869_v1, %v870_v7 }
 0x6d9   :  { %v862_v48 = vmax.f32 %v857_v42, 0.0 }
 0x6db   :  { %v873_v61 = vsel %vm31_vm0, %v862_v48, -inf }
 0x6dc   :  { %v874_v63 = vmax.f32 %v872_v60, %v873_v61 }
 0x6de   :  { %v875_v0 = vrot.slane %v874_v63, 4 }
 0x6e0   :  { %v876_v46 = vmax.f32 %v874_v63, %v875_v0 }
 0x6e2   :  { %v877_v5 = vrot.slane %v876_v46, 2 }
 0x6e4   :  { %v878_v58 = vmax.f32 %v876_v46, %v877_v5 }
 0x6e6   :  { %v879_v10 = vrot.slane %v878_v58, 1 }
 0x6e8   :  { %v880_v11 = vmax.f32 %v878_v58, %v879_v10 }
 0x6ea   :  { %v882_v15 = vsel %vm881_vm1, %v871_v55, %v880_v11 }
 0x6eb   :  { %980 = vmatmul.msk.f32.vlgmr.msrb.gmra.mxu1 %vm31_vm0, %v882_v15  ;;  %940 = vst.msk [vmem:[%s1376_s2 + $0x18] sm:$0x3] %vm939_vm6, %v882_v15 }
 0x768   :  { %v904_v8 = vpop.f32.mrf.mxu1 }
 0x769   :  { %v905_v51 = vadd.f32 %v993_v2, %v904_v8 }
 0x76b   :  { %v908_v16 = vsel %vm907_vm7, %v905_v51, -inf }
 0x76c   :  { %909 = vmax.xlane.f32.xlu0 %v908_v16 }
 0x7df   :  { %v910_v17 = vpop.xlane.xlu0 %909 }
 0x7e0   :  { %v911_v14 = vsub.f32 %v905_v51, %v910_v17 }
 0x7e2   :  { %v912_v3 = vmul.f32 1.442695, %v911_v14 }
 0x7e4   :  { %1002 = vpow2.f32 %v912_v3 }
 0x7ea   :  { %v1003_v18 = vpop.eup %1002 }
 0x7eb   :  { %v914_v19 = vsel %vm907_vm7, %v1003_v18, 0.0 }
 0x7ec   :  { %915 = vadd.xlane.f32.xlu1 %v914_v19 }
 0x85f   :  { %v916_v20 = vpop.xlane.xlu1 %915 }
 0x860   :  { %1004 = vrcp.f32 %v916_v20  ;;  %v928_v23 = vand.u32 2147483648, %v916_v20  ;;  %v926_v24 = vand.u32 2147483647, %v916_v20  ;;  %vm922_vm8 = vweird.f32 %v916_v20 }
 0x862   :  { %v929_v27 = vor.u32 1.1754944e-38, %v928_v23  ;;  %vm927_vm10 = vcmp.eq.f32.partialorder %v926_v24, 8.507059e+37 }
 0x866   :  { %v1005_v25 = vpop.eup %1004 }
 0x867   :  { %v918_v21 = vmul.f32 %v1005_v25, %v916_v20  ;;  %vm923_vm0 = vweird.f32 %v1005_v25 }
 0x868   :  { %vm924_vm9 = vmor %vm922_vm8, %vm923_vm0 }
 0x869   :  { %v919_v22 = vsub.f32 1.0, %v918_v21 }
 0x86b   :  { %v920_v4 = vmul.f32 %v1005_v25, %v919_v22 }
 0x86d   :  { %v921_v26 = vadd.f32 %v1005_v25, %v920_v4 }
 0x86f   :  { %v925_v29 = vsel %vm924_vm9, %v1005_v25, %v921_v26 }
 0x870   :  { %v930_v30 = vsel %vm927_vm10, %v929_v27, %v925_v29 }
 0x871   :  { %v931_v31 = vmul.f32 %v1003_v18, %v930_v30 }
 0x873   :  { %938 = vst.msk [vmem:[%s1376_s2 + $0x10] sm:$0x3] %vm907_vm7, %v931_v31 }
 0x874   :  { %945 = vsyncpa [#allocation4], 1 }

</bundles_post_ra>
